<compile_context>
chip_gen: v7x
topology: tpu7x:2x2x1
jax: 0.10.0
libtpu: 0.0.40
codegen_flags: <defaults>
</compile_context>

<pallas_src>
import jax
import jax.numpy as jnp
from jax.experimental import pallas as pl
from jax.experimental.pallas import tpu as pltpu


# ----------------------------------------------------------------------------
# Kernels
# ----------------------------------------------------------------------------
def _moe_kernel_packed(x1_ref, x2_ref, w_ref, out1_ref, out2_ref):
    """Lane-packed path: tiles are (TB, 128); w is (128, 256) block-broadcast.

    w[:, :128] / w[:, 128:] are built so that d @ w yields, for every lane of a
    16-lane (= H-lane) group, the gate-1 / gate-2 logit of the original row
    packed into that group -- i.e. the gates come out already lane-broadcast.
    """
    x1 = x1_ref[...]                        # (TB, 128)
    x2 = x2_ref[...]                        # (TB, 128)
    d = x1 - x2                             # (TB, 128)
    s = jnp.dot(d, w_ref[...], preferred_element_type=jnp.float32)   # (TB, 256)
    g1 = jax.nn.sigmoid(s[:, :128])         # weight on x1, gate 1 (lane-broadcast)
    g2 = jax.nn.sigmoid(s[:, 128:])         # weight on x1, gate 2
    out1_ref[...] = x2 + g1 * d
    out2_ref[...] = x2 + g2 * d


def _moe_kernel_plain(x1_ref, x2_ref, w_ref, out1_ref, out2_ref):
    """Fallback path: tiles are (TB, H); w is lane-dense (2, H).

    Logits via VPU multiply + XLU lane reduction (hidden under the DMA slots);
    no MXU and no padded-N matmul.
    """
    x1 = x1_ref[...]                        # (TB, H)
    x2 = x2_ref[...]                        # (TB, H)
    d = x1 - x2                             # (TB, H)
    s1 = jnp.sum(d * w_ref[0:1, :], axis=-1, keepdims=True)   # (TB, 1)
    s2 = jnp.sum(d * w_ref[1:2, :], axis=-1, keepdims=True)   # (TB, 1)
    out1_ref[...] = x2 + jax.nn.sigmoid(s1) * d
    out2_ref[...] = x2 + jax.nn.sigmoid(s2) * d


# ----------------------------------------------------------------------------
# Wrapper
# ----------------------------------------------------------------------------
def _tpu_vmem_capacity_bytes():
    try:
        cap = getattr(pltpu.get_tpu_info(), "vmem_capacity_bytes", None)
        if cap:
            return int(cap)
    except Exception:
        pass
    # Conservative default (v7x-class 64 MiB) if the query is unavailable.
    return 64 * 1024 * 1024


def _round8_down(n):
    return max(8, (int(n) // 8) * 8)


def _round8_up(n):
    return max(8, ((int(n) + 7) // 8) * 8)


def _auto_block_rows(n_rows, row_elems, per_buffer_bytes):
    """Bytes-based tile sizing with a >=2-grid-step cap (v7x megacore)."""
    tb = per_buffer_bytes // (row_elems * 4)          # f32 rows per ~target bytes
    half = _round8_up(-(-n_rows // 2))                # cdiv(n_rows, 2), mult of 8
    tb = min(tb, half, _round8_up(n_rows))
    return _round8_down(tb)


def moe_net(inputs_1, inputs_2, w1, b1, w2, b2, *, block_rows=None):
    """inputs_*: (B, H) f32; w*: (1, H) f32; b*: (1, 1) f32.

    b1/b2 are accepted for parity with the PyTorch module but are unused: a
    bias added to both expert logits cancels exactly in the 2-way softmax.

    block_rows (optional) is in rows of the *kernel layout* (packed rows of
    128 lanes when the lane-packing path is taken); it is clamped against the
    scoped-VMEM limit.
    """
    del b1, b2
    B, H = inputs_1.shape

    cap = _tpu_vmem_capacity_bytes()
    small_vmem = cap <= 64 * 1024 * 1024                   # v7x-class
    vmem_limit = (48 if small_vmem else 64) * 1024 * 1024
    per_buffer_target = (3 if small_vmem else 4) * 1024 * 1024

    x1 = inputs_1.astype(jnp.float32)
    x2 = inputs_2.astype(jnp.float32)
    w1v = jnp.reshape(w1, (H,)).astype(jnp.float32)
    w2v = jnp.reshape(w2, (H,)).astype(jnp.float32)

    # Lane-packing path: valid whenever H divides 128 and whole original rows
    # fit in each packed 128-lane row (free row-major reshape).
    lane_pack = (H < 128) and (128 % H == 0) and (B % (128 // H) == 0)

    if lane_pack:
        R = 128 // H                                        # original rows per packed row
        rows, lanes = B // R, 128
        xa = x1.reshape(rows, 128)
        xb = x2.reshape(rows, 128)
        # Block-broadcast weight: blk_k[j*H + i, j*H + c] = w_k[i] for all c.
        ones_h = jnp.ones((H,), jnp.float32)
        eye_r = jnp.eye(R, dtype=jnp.float32)
        blk1 = jnp.kron(eye_r, jnp.outer(w1v, ones_h))      # (128, 128)
        blk2 = jnp.kron(eye_r, jnp.outer(w2v, ones_h))      # (128, 128)
        w_arg = jnp.concatenate([blk1, blk2], axis=1)       # (128, 256)
        w_spec = pl.BlockSpec((128, 256), lambda i: (0, 0))
        weight_bytes = 128 * 256 * 4
        kernel = _moe_kernel_packed
    else:
        rows, lanes = B, H
        xa, xb = x1, x2
        w_arg = jnp.stack([w1v, w2v], axis=0)               # (2, H) lane-dense
        w_spec = pl.BlockSpec((2, H), lambda i: (0, 0))
        weight_bytes = 2 * H * 4
        kernel = _moe_kernel_plain

    if block_rows is None:
        TB = _auto_block_rows(rows, lanes, per_buffer_target)
    else:
        TB = _round8_down(block_rows)
    # Clamp: 4 streams x 2 pipeline buffers x (TB, lanes) f32 + weight + headroom
    # must stay inside the scoped-VMEM limit (critical on v7x's 64 MiB VMEM).
    budget = vmem_limit - 2 * weight_bytes - 4 * 1024 * 1024
    max_tb = _round8_down(budget // (8 * lanes * 4))
    TB = min(TB, max_tb)

    row_spec = pl.BlockSpec((TB, lanes), lambda i: (i, 0))
    out_shape = (jax.ShapeDtypeStruct((rows, lanes), jnp.float32),
                 jax.ShapeDtypeStruct((rows, lanes), jnp.float32))

    o1, o2 = pl.pallas_call(
        kernel,
        out_shape=out_shape,
        grid_spec=pltpu.PrefetchScalarGridSpec(
            num_scalar_prefetch=0,
            grid=(pl.cdiv(rows, TB),),
            in_specs=[row_spec, row_spec, w_spec],
            out_specs=[row_spec, row_spec],
        ),
        compiler_params=pltpu.CompilerParams(
            dimension_semantics=("parallel",),      # megacore sharding on v7x
            vmem_limit_bytes=vmem_limit,
        ),
    )(xa, xb, w_arg)

    if lane_pack:
        o1 = o1.reshape(B, H)
        o2 = o2.reshape(B, H)
    return o1, o2


# ----------------------------------------------------------------------------
# Pure-JAX reference mirroring the PyTorch forward (bias included)
# ----------------------------------------------------------------------------
def moe_net_ref(inputs_1, inputs_2, w1, b1, w2, b2):
    inp = jnp.stack([inputs_1, inputs_2], axis=1)                        # (B, 2, H)

    def one_gate(w, b):
        logits = jnp.einsum('beh,oh->beo', inp, w) + b[None, None, :]    # (B, 2, 1)
        gate = jax.nn.softmax(logits, axis=1)                            # (B, 2, 1)
        gate = jnp.transpose(gate, (0, 2, 1))                            # (B, 1, 2)
        return jnp.einsum('bij,bjh->bih', gate, inp)[:, 0, :]            # (B, H)

    return one_gate(w1, b1[0]), one_gate(w2, b2[0])


if __name__ == "__main__":
    def run_case(B, H, block_rows, seed):
        key = jax.random.PRNGKey(seed)
        k1, k2, k3, k4, k5, k6 = jax.random.split(key, 6)
        x1 = jax.random.normal(k1, (B, H), dtype=jnp.float32)
        x2 = jax.random.normal(k2, (B, H), dtype=jnp.float32)
        # nn.init.normal_(mean=0, std=0.05) for gate weights; small uniform biases.
        w1 = 0.05 * jax.random.normal(k3, (1, H), dtype=jnp.float32)
        w2 = 0.05 * jax.random.normal(k4, (1, H), dtype=jnp.float32)
        b1 = 0.1 * jax.random.uniform(k5, (1, 1), dtype=jnp.float32) - 0.05
        b2 = 0.1 * jax.random.uniform(k6, (1, 1), dtype=jnp.float32) - 0.05

        o1, o2 = moe_net(x1, x2, w1, b1, w2, b2, block_rows=block_rows)
        o1 = jax.block_until_ready(o1)
        o2 = jax.block_until_ready(o2)
        r1, r2 = moe_net_ref(x1, x2, w1, b1, w2, b2)
        assert jnp.allclose(o1, r1, atol=1e-5, rtol=1e-5), ("gate1 mismatch", B, H)
        assert jnp.allclose(o2, r2, atol=1e-5, rtol=1e-5), ("gate2 mismatch", B, H)

    # max_turn=16 style shape -> lane-packed path ((64,16) viewed as (8,128)).
    run_case(B=64, H=16, block_rows=None, seed=0)
    # Lane-dense H=128 with a user tile and a 2-step batch grid (plain path).
    run_case(B=256, H=128, block_rows=128, seed=1)
    # Ragged batch (B not a multiple of 8): plain fallback + masked tail writeback.
    run_case(B=60, H=16, block_rows=None, seed=2)

    # TODO(synk): optional bf16 HBM I/O path (2x bandwidth) not enabled to keep
    # exact f32 parity with the PyTorch module.
    print("KERNEL_OK")
</pallas_src>

<mosaic_0001>
module attributes {stable_mosaic.version = 11 : i64} {
  func.func @_moe_kernel_packed(%arg0: i32, %arg1: memref<8x128xf32, #tpu.memory_space<vmem>>, %arg2: memref<8x128xf32, #tpu.memory_space<vmem>>, %arg3: memref<128x256xf32, #tpu.memory_space<vmem>>, %arg4: memref<8x128xf32, #tpu.memory_space<vmem>>, %arg5: memref<8x128xf32, #tpu.memory_space<vmem>>) attributes {dimension_semantics = [#tpu.dimension_semantics<parallel>], iteration_bounds = array<i64: 1>, scalar_prefetch = 0 : i64, scratch_operands = 0 : i64, tpu.core_type = #tpu.core_type<tc>, window_params = [{transform_indices = @transform_0, window_bounds = array<i64: 8, 128>}, {transform_indices = @transform_1, window_bounds = array<i64: 8, 128>}, {pipeline_mode = #tpu.pipeline_mode<synchronous>, transform_indices = @transform_2, window_bounds = array<i64: 128, 256>}, {transform_indices = @transform_3, window_bounds = array<i64: 8, 128>}, {transform_indices = @transform_4, window_bounds = array<i64: 8, 128>}]} {
    %c0 = arith.constant 0 : index
    %c0_0 = arith.constant 0 : index
    %0 = vector.load %arg1[%c0, %c0_0] : memref<8x128xf32, #tpu.memory_space<vmem>>, vector<8x128xf32>
    %c0_1 = arith.constant 0 : index
    %c0_2 = arith.constant 0 : index
    %1 = vector.load %arg2[%c0_1, %c0_2] : memref<8x128xf32, #tpu.memory_space<vmem>>, vector<8x128xf32>
    %2 = arith.subf %0, %1 : vector<8x128xf32>
    %c0_3 = arith.constant 0 : index
    %c0_4 = arith.constant 0 : index
    %3 = vector.load %arg3[%c0_3, %c0_4] : memref<128x256xf32, #tpu.memory_space<vmem>>, vector<128x256xf32>
    %cst = arith.constant dense<0.000000e+00> : vector<8x256xf32>
    %4 = tpu.matmul %2, %3, %cst {dimension_numbers = #tpu.dot_dimension_numbers<[1], [0], [0], [1], [0, 0, 1, 1], [], []>} : vector<8x128xf32>, vector<128x256xf32>, vector<8x256xf32> -> vector<8x256xf32>
    %5 = vector.extract_strided_slice %4 {offsets = [0, 0], sizes = [8, 128], strides = [1, 1]} : vector<8x256xf32> to vector<8x128xf32>
    %6 = arith.negf %5 : vector<8x128xf32>
    %7 = math.exp %6 : vector<8x128xf32>
    %cst_5 = arith.constant 1.000000e+00 : f32
    %8 = vector.broadcast %cst_5 : f32 to vector<8x128xf32>
    %9 = arith.addf %8, %7 : vector<8x128xf32>
    %10 = arith.divf %8, %9 : vector<8x128xf32>
    %11 = vector.extract_strided_slice %4 {offsets = [0, 128], sizes = [8, 128], strides = [1, 1]} : vector<8x256xf32> to vector<8x128xf32>
    %12 = arith.negf %11 : vector<8x128xf32>
    %13 = math.exp %12 : vector<8x128xf32>
    %cst_6 = arith.constant 1.000000e+00 : f32
    %14 = vector.broadcast %cst_6 : f32 to vector<8x128xf32>
    %15 = arith.addf %14, %13 : vector<8x128xf32>
    %16 = arith.divf %14, %15 : vector<8x128xf32>
    %17 = arith.mulf %10, %2 : vector<8x128xf32>
    %18 = arith.addf %1, %17 : vector<8x128xf32>
    %c0_7 = arith.constant 0 : index
    %c0_8 = arith.constant 0 : index
    %19 = vector.load %arg4[%c0_7, %c0_8] : memref<8x128xf32, #tpu.memory_space<vmem>>, vector<8x128xf32>
    tpu.vector_store %arg4[%c0_7, %c0_8], %18 {strides = array<i32>} : memref<8x128xf32, #tpu.memory_space<vmem>>, vector<8x128xf32>,
    %20 = arith.mulf %16, %2 : vector<8x128xf32>
    %21 = arith.addf %1, %20 : vector<8x128xf32>
    %c0_9 = arith.constant 0 : index
    %c0_10 = arith.constant 0 : index
    %22 = vector.load %arg5[%c0_9, %c0_10] : memref<8x128xf32, #tpu.memory_space<vmem>>, vector<8x128xf32>
    tpu.vector_store %arg5[%c0_9, %c0_10], %21 {strides = array<i32>} : memref<8x128xf32, #tpu.memory_space<vmem>>, vector<8x128xf32>,
    return
  }
  func.func @transform_0(%arg0: i32) -> (i32, i32) {
    %c0_i32 = arith.constant 0 : i32
    %c0_i32_0 = arith.constant 0 : i32
    return %arg0, %c0_i32 : i32, i32
  }
  func.func @transform_1(%arg0: i32) -> (i32, i32) {
    %c0_i32 = arith.constant 0 : i32
    %c0_i32_0 = arith.constant 0 : i32
    return %arg0, %c0_i32 : i32, i32
  }
  func.func @transform_2(%arg0: i32) -> (i32, i32) {
    %c0_i32 = arith.constant 0 : i32
    %c0_i32_0 = arith.constant 0 : i32
    %c0_i32_1 = arith.constant 0 : i32
    return %c0_i32, %c0_i32_0 : i32, i32
  }
  func.func @transform_3(%arg0: i32) -> (i32, i32) {
    %c0_i32 = arith.constant 0 : i32
    %c0_i32_0 = arith.constant 0 : i32
    return %arg0, %c0_i32 : i32, i32
  }
  func.func @transform_4(%arg0: i32) -> (i32, i32) {
    %c0_i32 = arith.constant 0 : i32
    %c0_i32_0 = arith.constant 0 : i32
    return %arg0, %c0_i32 : i32, i32
  }
}

</mosaic_0001>

<bundles_post_ra>
// kernel: tpu_custom_call.1
= control target key start
LH: loop header
LB: loop body
LE: loop exit
PB: predicated region body
PF: predicated region fallthrough
CT: control target
= control target key end

     0   :  { %10 = vsyncpa [#allocation3], 0  ;;  %s470_s0 = inlined_call_operand.hbm [shape: f32[8,128], index: 0, kind: input, shape index: {}]   ;;  %s471_s1 = inlined_call_operand.hbm [shape: f32[8,128], index: 1, kind: input, shape index: {}]   ;;  %s472_s2 = inlined_call_operand.hbm [shape: f32[128,256], index: 2, kind: input, shape index: {}]   ;;  %s473_s3 = inlined_call_operand.hbm [shape: f32[8,128], index: 3, kind: output, shape index: {0}]   ;;  %s474_s4 = inlined_call_operand.hbm [shape: f32[8,128], index: 4, kind: output, shape index: {1}]  }
   0x1   :  { %11 = vsyncpa [#allocation6], 0 }
   0x2   :  { %12 = vsyncpa [#allocation4], 0 }
   0x3   :  { %13 = vsyncpa [#allocation10], 0  ;;  %s377_s15 = smov [#allocation5]   ;;  %s378_s17 = smov [#allocation2]  }
   0x4   :  { %s30_s16 = sshll.u32 %s377_s15, 4  ;;  %s20_s18 = sshll.u32 %s378_s17, 4  ;;  %s31_s16 = int_to_ptr.vmem [resolvable:$true] %s30_s16  ;;  %s21_s18 = int_to_ptr.vmem [resolvable:$true] %s20_s18 }
   0x5   :  { %s259_s21 = scalar_lea.hbm %s471_s1, 128 }
   0x6   :  { %p260_p0 = scmp.ne.s32.totalorder %s471_s1, %s259_s21  ;;  %p263_p1 = scmp.lt.u32.totalorder %s259_s21, %s471_s1 }
   0x8   :  { %p265_p2 = pnand %p263_p1, %p260_p0 }
   0xa   :  { %268 = shalt.err (!%p265_p2)
}
   0xb   :  { %s269_s26 = scalar_lea.vmem %s31_s16, 128  ;;  %p274_p4 = scmp.lt.s32.totalorder %s31_s16, %s31_s16 }
   0xc   :  { %p270_p3 = scmp.ne.s32.totalorder %s31_s16, %s269_s26  ;;  %p275_p5 = scmp.lt.s32.totalorder %s269_s26, %s269_s26 }
   0xe   :  { %p276_p6 = por %p275_p5, %p274_p4 }
  0x10   :  { %p277_p7 = pnand %p276_p6, %p270_p3 }
  0x12   :  { %280 = shalt.err (!%p277_p7)
}
  0x13   :  { %33 = dma.hbm_to_vmem [thread:$0]  %s471_s1, 128, %s31_s16, [#allocation6]  }
  0x14   :  { %s281_s5 = scalar_lea.hbm %s470_s0, 128 }
  0x15   :  { %p282_p8 = scmp.ne.s32.totalorder %s470_s0, %s281_s5  ;;  %p285_p9 = scmp.lt.u32.totalorder %s281_s5, %s470_s0 }
  0x17   :  { %p287_p10 = pnand %p285_p9, %p282_p8 }
  0x19   :  { %290 = shalt.err (!%p287_p10)
}
  0x1a   :  { %s291_s10 = scalar_lea.vmem %s21_s18, 128  ;;  %p296_p12 = scmp.lt.s32.totalorder %s21_s18, %s21_s18 }
  0x1b   :  { %p292_p11 = scmp.ne.s32.totalorder %s21_s18, %s291_s10  ;;  %p297_p13 = scmp.lt.s32.totalorder %s291_s10, %s291_s10 }
  0x1d   :  { %p298_p0 = por %p297_p13, %p296_p12 }
  0x1f   :  { %p299_p1 = pnand %p298_p0, %p292_p11 }
  0x21   :  { %302 = shalt.err (!%p299_p1)
}
  0x22   :  { %23 = dma.hbm_to_vmem [thread:$0]  %s470_s0, 128, %s21_s18, [#allocation3]  }
  0x23   :  { %s379_s12 = smov [#allocation7]   ;;  %s303_s16 = scalar_lea.hbm %s472_s2, 4096 }
  0x24   :  { %s39_s13 = sshll.u32 %s379_s12, 4  ;;  %p304_p2 = scmp.ne.s32.totalorder %s472_s2, %s303_s16  ;;  %s40_s13 = int_to_ptr.vmem [resolvable:$true] %s39_s13 }
  0x25   :  { %p307_p3 = scmp.lt.u32.totalorder %s303_s16, %s472_s2 }
  0x27   :  { %p309_p4 = pnand %p307_p3, %p304_p2 }
  0x29   :  { %312 = shalt.err (!%p309_p4)
}
  0x2a   :  { %s313_s22 = scalar_lea.vmem %s40_s13, 4096  ;;  %p318_p6 = scmp.lt.s32.totalorder %s40_s13, %s40_s13 }
  0x2b   :  { %p314_p5 = scmp.ne.s32.totalorder %s40_s13, %s313_s22  ;;  %p319_p7 = scmp.lt.s32.totalorder %s313_s22, %s313_s22 }
  0x2d   :  { %p320_p8 = por %p319_p7, %p318_p6 }
  0x2f   :  { %p321_p9 = pnand %p320_p8, %p314_p5 }
  0x31   :  { %324 = shalt.err (!%p321_p9)
}
  0x32   :  { %s380_s0 = smov 256   ;;  %s381_s18 = smov 16  }
  0x33   :  { %45 = dma.hbm_to_vmem [thread:$0]  %s472_s2, 4096, %s40_s13, [#allocation6], %s380_s0, %s380_s0, %s381_s18  }
  0x34   :  { %369 = dma.done.wait [#allocation3], 128  }
  0x35   :  { %370 = vsyncadd [#allocation3], 4294967168 }
  0x36   :  { %371 = dma.done.wait [#allocation6], 4224  }
  0x37   :  { %372 = vsyncadd [#allocation6], 4294963072  ;;  %v382_v0 = vmov 0.0   ;;  %v59_v1 = vld [vmem:[#allocation7 + $0x8] sm:$0xff]  ;;  %v61_v2 = vld [vmem:[#allocation7 + $0x18] sm:$0xff]  ;;  %s383_s2 = smov [#allocation8]  }
  0x38   :  { %154 = vmatprep.mubr.f32.mxu0 %v382_v0  ;;  %v58_v3 = vld [vmem:[#allocation7] sm:$0xff]  ;;  %v211_v4 = vpack.c.bf16 %v61_v2, %v59_v1  ;;  %v60_v5 = vld [vmem:[#allocation7 + $0x10] sm:$0xff]  ;;  %v63_v6 = vld [vmem:[#allocation7 + $0x28] sm:$0xff]  ;;  %s185_s25 = sshll.u32 %s383_s2, 4  ;;  %s384_s26 = smov [#allocation9]   ;;  %s186_s25 = int_to_ptr.vmem [resolvable:$true] %s185_s25 }
  0x39   :  { %v65_v7 = vld [vmem:[#allocation7 + $0x38] sm:$0xff]  ;;  %v213_v8 = vpack.c.bf16 %v60_v5, %v58_v3  ;;  %v62_v10 = vld [vmem:[#allocation7 + $0x20] sm:$0xff]  ;;  %v64_v11 = vld [vmem:[#allocation7 + $0x30] sm:$0xff]  ;;  %s195_s27 = sshll.u32 %s384_s26, 4  ;;  %s325_s28 = scalar_lea.vmem %s186_s25, 128  ;;  %s196_s27 = int_to_ptr.vmem [resolvable:$true] %s195_s27 }
  0x3a   :  { %v215_v9 = vpack.c.bf16 %v65_v7, %v63_v6  ;;  %v67_v12 = vld [vmem:[#allocation7 + $0x48] sm:$0xff]  ;;  %212 = vmatprep.subr.bf16.mxu0 %v211_v4  ;;  %v69_v13 = vld [vmem:[#allocation7 + $0x58] sm:$0xff]  ;;  %v217_v14 = vpack.c.bf16 %v64_v11, %v62_v10  ;;  %v66_v16 = vld [vmem:[#allocation7 + $0x40] sm:$0xff]  ;;  %p326_p10 = scmp.ne.s32.totalorder %s186_s25, %s325_s28  ;;  %p330_p11 = scmp.lt.s32.totalorder %s186_s25, %s186_s25 }
  0x3b   :  { %214 = vmatpush1.bf16.msra.mxu0 %v213_v8  ;;  %v219_v15 = vpack.c.bf16 %v69_v13, %v67_v12  ;;  %v68_v17 = vld [vmem:[#allocation7 + $0x50] sm:$0xff]  ;;  %v71_v18 = vld [vmem:[#allocation7 + $0x68] sm:$0xff]  ;;  %v73_v19 = vld [vmem:[#allocation7 + $0x78] sm:$0xff]  ;;  %p331_p12 = scmp.lt.s32.totalorder %s325_s28, %s325_s28 }
  0x3c   :  { %216 = vmatprep.subr.bf16.mxu0 %v215_v9  ;;  %v221_v20 = vpack.c.bf16 %v68_v17, %v66_v16  ;;  %v223_v21 = vpack.c.bf16 %v73_v19, %v71_v18  ;;  %v70_v22 = vld [vmem:[#allocation7 + $0x60] sm:$0xff]  ;;  %v72_v23 = vld [vmem:[#allocation7 + $0x70] sm:$0xff]  ;;  %v75_v24 = vld [vmem:[#allocation7 + $0x88] sm:$0xff] }
  0x3d   :  { %v77_v25 = vld [vmem:[#allocation7 + $0x98] sm:$0xff]  ;;  %v225_v26 = vpack.c.bf16 %v72_v23, %v70_v22  ;;  %v74_v28 = vld [vmem:[#allocation7 + $0x80] sm:$0xff]  ;;  %v76_v29 = vld [vmem:[#allocation7 + $0x90] sm:$0xff]  ;;  %p332_p13 = por %p331_p12, %p330_p11 }
  0x3e   :  { %v227_v27 = vpack.c.bf16 %v77_v25, %v75_v24  ;;  %v79_v30 = vld [vmem:[#allocation7 + $0xa8] sm:$0xff]  ;;  %v81_v31 = vld [vmem:[#allocation7 + $0xb8] sm:$0xff]  ;;  %v229_v32 = vpack.c.bf16 %v76_v29, %v74_v28  ;;  %v78_v34 = vld [vmem:[#allocation7 + $0xa0] sm:$0xff] }
  0x3f   :  { %218 = vmatpush1.bf16.msra.mxu0 %v217_v14  ;;  %v231_v33 = vpack.c.bf16 %v81_v31, %v79_v30  ;;  %v80_v35 = vld [vmem:[#allocation7 + $0xb0] sm:$0xff]  ;;  %v83_v36 = vld [vmem:[#allocation7 + $0xc8] sm:$0xff]  ;;  %v85_v37 = vld [vmem:[#allocation7 + $0xd8] sm:$0xff]  ;;  %p333_p0 = pnand %p332_p13, %p326_p10 }
  0x40   :  { %220 = vmatprep.subr.bf16.mxu0 %v219_v15  ;;  %v233_v38 = vpack.c.bf16 %v80_v35, %v78_v34  ;;  %v235_v39 = vpack.c.bf16 %v85_v37, %v83_v36  ;;  %v82_v40 = vld [vmem:[#allocation7 + $0xc0] sm:$0xff]  ;;  %v84_v41 = vld [vmem:[#allocation7 + $0xd0] sm:$0xff]  ;;  %v87_v42 = vld [vmem:[#allocation7 + $0xe8] sm:$0xff] }
  0x41   :  { %v89_v43 = vld [vmem:[#allocation7 + $0xf8] sm:$0xff]  ;;  %v237_v44 = vpack.c.bf16 %v84_v41, %v82_v40  ;;  %v86_v46 = vld [vmem:[#allocation7 + $0xe0] sm:$0xff]  ;;  %v88_v47 = vld [vmem:[#allocation7 + $0xf0] sm:$0xff] }
  0x42   :  { %v239_v45 = vpack.c.bf16 %v89_v43, %v87_v42  ;;  %v241_v48 = vpack.c.bf16 %v88_v47, %v86_v46  ;;  %v55_v49 = vld [vmem:[#allocation2] sm:$0xff]  ;;  %v56_v50 = vld [vmem:[#allocation5] sm:$0xff] }
  0x43   :  { %222 = vmatpush1.bf16.msra.mxu0 %v221_v20  ;;  %v57_v51 = vsub.f32 %v55_v49, %v56_v50 }
  0x44   :  { %224 = vmatprep.subr.bf16.mxu0 %v223_v21 }
  0x47   :  { %226 = vmatpush1.bf16.msra.mxu0 %v225_v26 }
  0x48   :  { %228 = vmatprep.subr.bf16.mxu0 %v227_v27 }
  0x4b   :  { %230 = vmatpush1.bf16.msra.mxu0 %v229_v32 }
  0x4c   :  { %232 = vmatprep.subr.bf16.mxu0 %v231_v33 }
  0x4f   :  { %234 = vmatpush1.bf16.msra.mxu0 %v233_v38 }
  0x50   :  { %236 = vmatprep.subr.bf16.mxu0 %v235_v39 }
  0x53   :  { %238 = vmatpush1.bf16.msra.mxu0 %v237_v44 }
  0x54   :  { %240 = vmatprep.subr.bf16.mxu0 %v239_v45 }
  0x57   :  { %242 = vmatpush1.bf16.msra.mxu0 %v241_v48 }
  0x5a   :  { %155 = vmatmul.mubr.f32.vlgmr.msra.gmra.mrb[0].mxu0 %v57_v51 }
 0x12d   :  { %v156_v52 = vpop.f32.mrb[0].mxu0 }
 0x12e   :  { %v209_v53 = vmul.f32 -1.442695, %v156_v52  ;;  %v158_v54 = vpop.f32.mrb[1].mxu0 }
 0x12f   :  { %v210_v55 = vmul.f32 -1.442695, %v158_v54 }
 0x130   :  { %251 = vpow2.f32 %v209_v53 }
 0x131   :  { %253 = vpow2.f32 %v210_v55 }
 0x13a   :  { %v252_v56 = vpop.eup %251 }
 0x13b   :  { %v254_v57 = vpop.eup %253  ;;  %v164_v58 = vadd.f32 1.0, %v252_v56 }
 0x13c   :  { %v170_v59 = vadd.f32 1.0, %v254_v57 }
 0x13d   :  { %255 = vrcp.f32 %v164_v58 }
 0x13e   :  { %257 = vrcp.f32 %v170_v59 }
 0x147   :  { %v256_v60 = vpop.eup %255 }
 0x148   :  { %v258_v61 = vpop.eup %257  ;;  %v173_v62 = vmul.f32 %v256_v60, %v57_v51 }
 0x149   :  { %v176_v63 = vmul.f32 %v258_v61, %v57_v51 }
 0x14a   :  { %v174_v0 = vadd.f32 %v173_v62, %v56_v50 }
 0x14b   :  { %v177_v1 = vadd.f32 %v176_v63, %v56_v50 }
 0x14c   :  { %175 = vst [vmem:[#allocation8] sm:$0xff] %v174_v0 }
 0x14d   :  { %336 = shalt.err (!%p333_p0)
}
 0x14e   :  { %s337_s5 = scalar_lea.hbm %s473_s3, 128 }
 0x14f   :  { %p338_p1 = scmp.ne.s32.totalorder %s473_s3, %s337_s5  ;;  %p341_p2 = scmp.lt.u32.totalorder %s337_s5, %s473_s3 }
 0x151   :  { %p343_p3 = pnand %p341_p2, %p338_p1 }
 0x153   :  { %346 = shalt.err (!%p343_p3)
}
 0x154   :  { %188 = dma.vmem_to_hbm [thread:$0]  %s186_s25, 128, %s473_s3, [#allocation4]   ;;  %178 = vst [vmem:[#allocation9] sm:$0xff] %v177_v1 }
 0x155   :  { %s347_s11 = scalar_lea.vmem %s196_s27, 128  ;;  %p352_p5 = scmp.lt.s32.totalorder %s196_s27, %s196_s27 }
 0x156   :  { %p348_p4 = scmp.ne.s32.totalorder %s196_s27, %s347_s11  ;;  %p353_p6 = scmp.lt.s32.totalorder %s347_s11, %s347_s11 }
 0x158   :  { %p354_p7 = por %p353_p6, %p352_p5 }
 0x15a   :  { %p355_p8 = pnand %p354_p7, %p348_p4 }
 0x15c   :  { %358 = shalt.err (!%p355_p8)
}
 0x15d   :  { %s359_s14 = scalar_lea.hbm %s474_s4, 128 }
 0x15e   :  { %p360_p9 = scmp.ne.s32.totalorder %s474_s4, %s359_s14  ;;  %p363_p10 = scmp.lt.u32.totalorder %s359_s14, %s474_s4 }
 0x160   :  { %p365_p11 = pnand %p363_p10, %p360_p9 }
 0x162   :  { %368 = shalt.err (!%p365_p11)
}
 0x163   :  { %198 = dma.vmem_to_hbm [thread:$0]  %s196_s27, 128, %s474_s4, [#allocation10]  }
 0x164   :  { %373 = dma.done.wait [#allocation4], 128  }
 0x165   :  { %374 = vsyncadd [#allocation4], 4294967168 }
 0x166   :  { %375 = dma.done.wait [#allocation10], 128  }
 0x167   :  { %376 = vsyncadd [#allocation10], 4294967168 }
 0x168   :  { %205 = vsyncpa [#allocation3], 1 }
 0x169   :  { %206 = vsyncpa [#allocation6], 1 }
 0x16a   :  { %207 = vsyncpa [#allocation4], 1 }
 0x16b   :  { %208 = vsyncpa [#allocation10], 1 }

</bundles_post_ra>
